<compile_context>
chip_gen: v7x
topology: tpu7x:2x2x1
jax: 0.10.0
libtpu: 0.0.40
codegen_flags: <defaults>
</compile_context>

<pallas_src>
import jax
import jax.numpy as jnp
from jax.experimental import pallas as pl
from jax.experimental.pallas import tpu as pltpu


LAYER_DIMS = [(384, 256), (256, 128), (128, 64), (64, 128), (128, 256), (256, 384)]


def _round_up(x, m):
    return (x + m - 1) // m * m


def _cdiv(a, b):
    return -(-a // b)


def autoencoder_kernel(x_ref,
                       w1_ref, b1_ref, w2_ref, b2_ref, w3_ref, b3_ref,
                       w4_ref, b4_ref, w5_ref, b5_ref, w6_ref, b6_ref,
                       o_ref):
    """Full forward pass for one batch tile; all weights resident in VMEM."""

    def linear(h, w_ref, b_ref, relu):
        w = w_ref[...]
        # MXU matmul in the weight dtype (bf16 by default), f32 accumulation.
        y = jnp.dot(h.astype(w.dtype), w, preferred_element_type=jnp.float32)
        y = y + b_ref[...]                 # bias kept in f32
        if relu:
            y = jnp.maximum(y, 0.0)
            # Carry hidden activations in the weight dtype: halves VMEM ld/st
            # traffic for the big (tb, 128..384) intermediates and feeds the
            # next matmul natively (no per-layer cast on the MXU path).
            return y.astype(w.dtype)
        return y                           # final layer stays f32

    h = x_ref[...]
    # Encoder
    h = linear(h, w1_ref, b1_ref, True)    # (TB, 256)
    h = linear(h, w2_ref, b2_ref, True)    # (TB, 128)
    h = linear(h, w3_ref, b3_ref, True)    # (TB, 128) [64 real + 64 zero-pad lanes]
    # Decoder
    h = linear(h, w4_ref, b4_ref, True)    # (TB, 128)
    h = linear(h, w5_ref, b5_ref, True)    # (TB, 256)
    y = linear(h, w6_ref, b6_ref, False)   # (TB, 384) final layer: no ReLU
    o_ref[...] = y.astype(o_ref.dtype)


def prepare_params(params, *, weight_dtype=jnp.bfloat16):
    """Pad the 64-wide bottleneck to 128 lanes and reshape biases to (1, out).

    params: list of (W_t, b) with W_t shape (in, out) — transposed vs torch.
    Zero padding is numerically exact: padded output lanes of layer 3 are
    ReLU(0 + 0) = 0, and the corresponding (zero) input rows of layer 4
    contribute nothing.
    """
    prepared = []
    for w_t, b in params:
        din, dout = w_t.shape
        if dout == 64:  # layer 3: pad output features 64 -> 128 (zero columns)
            w_t = jnp.pad(w_t, ((0, 0), (0, 64)))
            b = jnp.pad(b, (0, 64))
        if din == 64:   # layer 4: pad input features 64 -> 128 (zero rows)
            w_t = jnp.pad(w_t, ((0, 64), (0, 0)))
        prepared.append((w_t.astype(weight_dtype),
                         b.astype(jnp.float32).reshape(1, -1)))
    return prepared


def _choose_tiling(B, tb_max):
    """Pick (tb, Bp, n_steps): minimal padding, >= 2 parallel steps if possible."""
    tb_max = max(8, _round_up(tb_max, 8))
    B8 = _round_up(max(B, 1), 8)            # pad only to a sublane multiple
    min_steps = 2 if B8 >= 16 else 1        # keep both v7x TensorCores busy
    n_steps = max(min_steps, _cdiv(B8, tb_max))
    tb = _round_up(_cdiv(B8, n_steps), 8)
    Bp = tb * n_steps
    return tb, Bp, n_steps


def autoencoder385_forward(x, params, *, tb_max=512, weight_dtype=jnp.bfloat16):
    """x: (B, 384) float32. params: list of (W_t, b), W_t: (in, out)."""
    B, D = x.shape
    assert D == 384

    prepared = prepare_params(params, weight_dtype=weight_dtype)
    tb, Bp, n_steps = _choose_tiling(B, tb_max)

    xp = x if Bp == B else jnp.pad(x, ((0, Bp - B), (0, 0)))

    flat_args = []
    in_specs = [pl.BlockSpec((tb, 384), lambda i: (i, 0))]
    for w_t, b in prepared:
        flat_args.append(w_t)
        flat_args.append(b)
        # Constant index maps: weights/biases DMA'd once, stay resident in VMEM.
        in_specs.append(pl.BlockSpec(w_t.shape, lambda i: (0, 0)))
        in_specs.append(pl.BlockSpec(b.shape, lambda i: (0, 0)))

    out = pl.pallas_call(
        autoencoder_kernel,
        out_shape=jax.ShapeDtypeStruct((Bp, 384), jnp.float32),
        grid_spec=pltpu.PrefetchScalarGridSpec(
            num_scalar_prefetch=0,
            grid=(n_steps,),
            in_specs=in_specs,
            out_specs=pl.BlockSpec((tb, 384), lambda i: (i, 0)),
        ),
        compiler_params=pltpu.CompilerParams(
            dimension_semantics=("parallel",),
            vmem_limit_bytes=32 * 1024 * 1024,
        ),
    )(xp, *flat_args)

    return out[:B] if Bp != B else out


def init_params(key):
    """Deterministic init matching Autoencoder385 layer shapes.

    Returns list of (W_t, b) with W_t shape (in, out) — transposed vs torch.
    """
    params = []
    for i, (din, dout) in enumerate(LAYER_DIMS):
        kw, kb = jax.random.split(jax.random.fold_in(key, i))
        bound = 1.0 / (din ** 0.5)  # torch.nn.Linear default-ish scale
        w_t = jax.random.uniform(kw, (din, dout), jnp.float32, -bound, bound)
        b = jax.random.uniform(kb, (dout,), jnp.float32, -bound, bound)
        params.append((w_t, b))
    return params


def reference_forward(x, params, *, compute_dtype=jnp.float32):
    """Pure-JAX reference; compute_dtype mirrors the kernel's weight dtype."""
    h = x
    n = len(params)
    for i, (w_t, b) in enumerate(params):
        y = jnp.dot(h.astype(compute_dtype), w_t.astype(compute_dtype),
                    preferred_element_type=jnp.float32) + b
        if i != n - 1:
            y = jnp.maximum(y, 0.0).astype(compute_dtype)
        h = y
    return h


if __name__ == "__main__":
    key = jax.random.PRNGKey(0)
    pkey, xkey = jax.random.split(key)
    params = init_params(pkey)

    # Batches exercising: tile-aligned (16), padding tail (13), multi-step (72).
    for B in (16, 13, 72):
        x = jax.random.normal(jax.random.fold_in(xkey, B), (B, 384), jnp.float32)

        # Default bf16 path (MXU-native), checked against a bf16 reference.
        out_bf16 = jax.block_until_ready(autoencoder385_forward(x, params))
        ref_bf16 = reference_forward(x, params, compute_dtype=jnp.bfloat16)
        assert out_bf16.shape == (B, 384)
        assert jnp.allclose(out_bf16, ref_bf16, atol=2e-2, rtol=2e-2), \
            f"bf16 mismatch at B={B}"

        # f32 path: structural exactness check against the f32 reference.
        out_f32 = jax.block_until_ready(
            autoencoder385_forward(x, params, weight_dtype=jnp.float32))
        ref_f32 = reference_forward(x, params, compute_dtype=jnp.float32)
        assert jnp.allclose(out_f32, ref_f32, atol=1e-4, rtol=1e-4), \
            f"f32 mismatch at B={B}"

    print("KERNEL_OK")
</pallas_src>

<mosaic_0001>
module attributes {stable_mosaic.version = 11 : i64} {
  func.func @autoencoder_kernel(%arg0: i32, %arg1: memref<8x384xf32, #tpu.memory_space<vmem>>, %arg2: memref<384x256xbf16, #tpu.memory_space<vmem>>, %arg3: memref<1x256xf32, #tpu.memory_space<vmem>>, %arg4: memref<256x128xbf16, #tpu.memory_space<vmem>>, %arg5: memref<1x128xf32, #tpu.memory_space<vmem>>, %arg6: memref<128x128xbf16, #tpu.memory_space<vmem>>, %arg7: memref<1x128xf32, #tpu.memory_space<vmem>>, %arg8: memref<128x128xbf16, #tpu.memory_space<vmem>>, %arg9: memref<1x128xf32, #tpu.memory_space<vmem>>, %arg10: memref<128x256xbf16, #tpu.memory_space<vmem>>, %arg11: memref<1x256xf32, #tpu.memory_space<vmem>>, %arg12: memref<256x384xbf16, #tpu.memory_space<vmem>>, %arg13: memref<1x384xf32, #tpu.memory_space<vmem>>, %arg14: memref<8x384xf32, #tpu.memory_space<vmem>>) attributes {dimension_semantics = [#tpu.dimension_semantics<parallel>], iteration_bounds = array<i64: 2>, scalar_prefetch = 0 : i64, scratch_operands = 0 : i64, tpu.core_type = #tpu.core_type<tc>, window_params = [{transform_indices = @transform_0, window_bounds = array<i64: 8, 384>}, {pipeline_mode = #tpu.pipeline_mode<synchronous>, transform_indices = @transform_1, window_bounds = array<i64: 384, 256>}, {pipeline_mode = #tpu.pipeline_mode<synchronous>, transform_indices = @transform_2, window_bounds = array<i64: 1, 256>}, {pipeline_mode = #tpu.pipeline_mode<synchronous>, transform_indices = @transform_3, window_bounds = array<i64: 256, 128>}, {pipeline_mode = #tpu.pipeline_mode<synchronous>, transform_indices = @transform_4, window_bounds = array<i64: 1, 128>}, {pipeline_mode = #tpu.pipeline_mode<synchronous>, transform_indices = @transform_5, window_bounds = array<i64: 128, 128>}, {pipeline_mode = #tpu.pipeline_mode<synchronous>, transform_indices = @transform_6, window_bounds = array<i64: 1, 128>}, {pipeline_mode = #tpu.pipeline_mode<synchronous>, transform_indices = @transform_7, window_bounds = array<i64: 128, 128>}, {pipeline_mode = #tpu.pipeline_mode<synchronous>, transform_indices = @transform_8, window_bounds = array<i64: 1, 128>}, {pipeline_mode = #tpu.pipeline_mode<synchronous>, transform_indices = @transform_9, window_bounds = array<i64: 128, 256>}, {pipeline_mode = #tpu.pipeline_mode<synchronous>, transform_indices = @transform_10, window_bounds = array<i64: 1, 256>}, {pipeline_mode = #tpu.pipeline_mode<synchronous>, transform_indices = @transform_11, window_bounds = array<i64: 256, 384>}, {pipeline_mode = #tpu.pipeline_mode<synchronous>, transform_indices = @transform_12, window_bounds = array<i64: 1, 384>}, {transform_indices = @transform_13, window_bounds = array<i64: 8, 384>}]} {
    %c0 = arith.constant 0 : index
    %c0_0 = arith.constant 0 : index
    %0 = vector.load %arg1[%c0, %c0_0] : memref<8x384xf32, #tpu.memory_space<vmem>>, vector<8x384xf32>
    %c0_1 = arith.constant 0 : index
    %c0_2 = arith.constant 0 : index
    %1 = vector.load %arg2[%c0_1, %c0_2] : memref<384x256xbf16, #tpu.memory_space<vmem>>, vector<384x256xbf16>
    %2 = arith.truncf %0 : vector<8x384xf32> to vector<8x384xbf16>
    %cst = arith.constant dense<0.000000e+00> : vector<8x256xf32>
    %3 = tpu.matmul %2, %1, %cst {dimension_numbers = #tpu.dot_dimension_numbers<[1], [0], [0], [1], [0, 0, 1, 1], [], []>} : vector<8x384xbf16>, vector<384x256xbf16>, vector<8x256xf32> -> vector<8x256xf32>
    %c0_3 = arith.constant 0 : index
    %c0_4 = arith.constant 0 : index
    %4 = vector.load %arg3[%c0_3, %c0_4] : memref<1x256xf32, #tpu.memory_space<vmem>>, vector<1x256xf32>
    %5 = vector.broadcast %4 : vector<1x256xf32> to vector<8x256xf32>
    %6 = arith.addf %3, %5 : vector<8x256xf32>
    %cst_5 = arith.constant 0.000000e+00 : f32
    %7 = vector.broadcast %cst_5 : f32 to vector<8x256xf32>
    %8 = arith.maximumf %6, %7 : vector<8x256xf32>
    %9 = arith.truncf %8 : vector<8x256xf32> to vector<8x256xbf16>
    %c0_6 = arith.constant 0 : index
    %c0_7 = arith.constant 0 : index
    %10 = vector.load %arg4[%c0_6, %c0_7] : memref<256x128xbf16, #tpu.memory_space<vmem>>, vector<256x128xbf16>
    %cst_8 = arith.constant dense<0.000000e+00> : vector<8x128xf32>
    %11 = tpu.matmul %9, %10, %cst_8 {dimension_numbers = #tpu.dot_dimension_numbers<[1], [0], [0], [1], [0, 0, 1, 1], [], []>} : vector<8x256xbf16>, vector<256x128xbf16>, vector<8x128xf32> -> vector<8x128xf32>
    %c0_9 = arith.constant 0 : index
    %c0_10 = arith.constant 0 : index
    %12 = vector.load %arg5[%c0_9, %c0_10] : memref<1x128xf32, #tpu.memory_space<vmem>>, vector<1x128xf32>
    %13 = vector.broadcast %12 : vector<1x128xf32> to vector<8x128xf32>
    %14 = arith.addf %11, %13 : vector<8x128xf32>
    %cst_11 = arith.constant 0.000000e+00 : f32
    %15 = vector.broadcast %cst_11 : f32 to vector<8x128xf32>
    %16 = arith.maximumf %14, %15 : vector<8x128xf32>
    %17 = arith.truncf %16 : vector<8x128xf32> to vector<8x128xbf16>
    %c0_12 = arith.constant 0 : index
    %c0_13 = arith.constant 0 : index
    %18 = vector.load %arg6[%c0_12, %c0_13] : memref<128x128xbf16, #tpu.memory_space<vmem>>, vector<128x128xbf16>
    %cst_14 = arith.constant dense<0.000000e+00> : vector<8x128xf32>
    %19 = tpu.matmul %17, %18, %cst_14 {dimension_numbers = #tpu.dot_dimension_numbers<[1], [0], [0], [1], [0, 0, 1, 1], [], []>} : vector<8x128xbf16>, vector<128x128xbf16>, vector<8x128xf32> -> vector<8x128xf32>
    %c0_15 = arith.constant 0 : index
    %c0_16 = arith.constant 0 : index
    %20 = vector.load %arg7[%c0_15, %c0_16] : memref<1x128xf32, #tpu.memory_space<vmem>>, vector<1x128xf32>
    %21 = vector.broadcast %20 : vector<1x128xf32> to vector<8x128xf32>
    %22 = arith.addf %19, %21 : vector<8x128xf32>
    %cst_17 = arith.constant 0.000000e+00 : f32
    %23 = vector.broadcast %cst_17 : f32 to vector<8x128xf32>
    %24 = arith.maximumf %22, %23 : vector<8x128xf32>
    %25 = arith.truncf %24 : vector<8x128xf32> to vector<8x128xbf16>
    %c0_18 = arith.constant 0 : index
    %c0_19 = arith.constant 0 : index
    %26 = vector.load %arg8[%c0_18, %c0_19] : memref<128x128xbf16, #tpu.memory_space<vmem>>, vector<128x128xbf16>
    %cst_20 = arith.constant dense<0.000000e+00> : vector<8x128xf32>
    %27 = tpu.matmul %25, %26, %cst_20 {dimension_numbers = #tpu.dot_dimension_numbers<[1], [0], [0], [1], [0, 0, 1, 1], [], []>} : vector<8x128xbf16>, vector<128x128xbf16>, vector<8x128xf32> -> vector<8x128xf32>
    %c0_21 = arith.constant 0 : index
    %c0_22 = arith.constant 0 : index
    %28 = vector.load %arg9[%c0_21, %c0_22] : memref<1x128xf32, #tpu.memory_space<vmem>>, vector<1x128xf32>
    %29 = vector.broadcast %28 : vector<1x128xf32> to vector<8x128xf32>
    %30 = arith.addf %27, %29 : vector<8x128xf32>
    %cst_23 = arith.constant 0.000000e+00 : f32
    %31 = vector.broadcast %cst_23 : f32 to vector<8x128xf32>
    %32 = arith.maximumf %30, %31 : vector<8x128xf32>
    %33 = arith.truncf %32 : vector<8x128xf32> to vector<8x128xbf16>
    %c0_24 = arith.constant 0 : index
    %c0_25 = arith.constant 0 : index
    %34 = vector.load %arg10[%c0_24, %c0_25] : memref<128x256xbf16, #tpu.memory_space<vmem>>, vector<128x256xbf16>
    %cst_26 = arith.constant dense<0.000000e+00> : vector<8x256xf32>
    %35 = tpu.matmul %33, %34, %cst_26 {dimension_numbers = #tpu.dot_dimension_numbers<[1], [0], [0], [1], [0, 0, 1, 1], [], []>} : vector<8x128xbf16>, vector<128x256xbf16>, vector<8x256xf32> -> vector<8x256xf32>
    %c0_27 = arith.constant 0 : index
    %c0_28 = arith.constant 0 : index
    %36 = vector.load %arg11[%c0_27, %c0_28] : memref<1x256xf32, #tpu.memory_space<vmem>>, vector<1x256xf32>
    %37 = vector.broadcast %36 : vector<1x256xf32> to vector<8x256xf32>
    %38 = arith.addf %35, %37 : vector<8x256xf32>
    %cst_29 = arith.constant 0.000000e+00 : f32
    %39 = vector.broadcast %cst_29 : f32 to vector<8x256xf32>
    %40 = arith.maximumf %38, %39 : vector<8x256xf32>
    %41 = arith.truncf %40 : vector<8x256xf32> to vector<8x256xbf16>
    %c0_30 = arith.constant 0 : index
    %c0_31 = arith.constant 0 : index
    %42 = vector.load %arg12[%c0_30, %c0_31] : memref<256x384xbf16, #tpu.memory_space<vmem>>, vector<256x384xbf16>
    %cst_32 = arith.constant dense<0.000000e+00> : vector<8x384xf32>
    %43 = tpu.matmul %41, %42, %cst_32 {dimension_numbers = #tpu.dot_dimension_numbers<[1], [0], [0], [1], [0, 0, 1, 1], [], []>} : vector<8x256xbf16>, vector<256x384xbf16>, vector<8x384xf32> -> vector<8x384xf32>
    %c0_33 = arith.constant 0 : index
    %c0_34 = arith.constant 0 : index
    %44 = vector.load %arg13[%c0_33, %c0_34] : memref<1x384xf32, #tpu.memory_space<vmem>>, vector<1x384xf32>
    %45 = vector.broadcast %44 : vector<1x384xf32> to vector<8x384xf32>
    %46 = arith.addf %43, %45 : vector<8x384xf32>
    %c0_35 = arith.constant 0 : index
    %c0_36 = arith.constant 0 : index
    %47 = vector.load %arg14[%c0_35, %c0_36] : memref<8x384xf32, #tpu.memory_space<vmem>>, vector<8x384xf32>
    tpu.vector_store %arg14[%c0_35, %c0_36], %46 {strides = array<i32>} : memref<8x384xf32, #tpu.memory_space<vmem>>, vector<8x384xf32>,
    return
  }
  func.func @transform_0(%arg0: i32) -> (i32, i32) {
    %c0_i32 = arith.constant 0 : i32
    %c0_i32_0 = arith.constant 0 : i32
    return %arg0, %c0_i32 : i32, i32
  }
  func.func @transform_1(%arg0: i32) -> (i32, i32) {
    %c0_i32 = arith.constant 0 : i32
    %c0_i32_0 = arith.constant 0 : i32
    %c0_i32_1 = arith.constant 0 : i32
    return %c0_i32, %c0_i32_0 : i32, i32
  }
  func.func @transform_2(%arg0: i32) -> (i32, i32) {
    %c0_i32 = arith.constant 0 : i32
    %c0_i32_0 = arith.constant 0 : i32
    %c0_i32_1 = arith.constant 0 : i32
    return %c0_i32, %c0_i32_0 : i32, i32
  }
  func.func @transform_3(%arg0: i32) -> (i32, i32) {
    %c0_i32 = arith.constant 0 : i32
    %c0_i32_0 = arith.constant 0 : i32
    %c0_i32_1 = arith.constant 0 : i32
    return %c0_i32, %c0_i32_0 : i32, i32
  }
  func.func @transform_4(%arg0: i32) -> (i32, i32) {
    %c0_i32 = arith.constant 0 : i32
    %c0_i32_0 = arith.constant 0 : i32
    %c0_i32_1 = arith.constant 0 : i32
    return %c0_i32, %c0_i32_0 : i32, i32
  }
  func.func @transform_5(%arg0: i32) -> (i32, i32) {
    %c0_i32 = arith.constant 0 : i32
    %c0_i32_0 = arith.constant 0 : i32
    %c0_i32_1 = arith.constant 0 : i32
    return %c0_i32, %c0_i32_0 : i32, i32
  }
  func.func @transform_6(%arg0: i32) -> (i32, i32) {
    %c0_i32 = arith.constant 0 : i32
    %c0_i32_0 = arith.constant 0 : i32
    %c0_i32_1 = arith.constant 0 : i32
    return %c0_i32, %c0_i32_0 : i32, i32
  }
  func.func @transform_7(%arg0: i32) -> (i32, i32) {
    %c0_i32 = arith.constant 0 : i32
    %c0_i32_0 = arith.constant 0 : i32
    %c0_i32_1 = arith.constant 0 : i32
    return %c0_i32, %c0_i32_0 : i32, i32
  }
  func.func @transform_8(%arg0: i32) -> (i32, i32) {
    %c0_i32 = arith.constant 0 : i32
    %c0_i32_0 = arith.constant 0 : i32
    %c0_i32_1 = arith.constant 0 : i32
    return %c0_i32, %c0_i32_0 : i32, i32
  }
  func.func @transform_9(%arg0: i32) -> (i32, i32) {
    %c0_i32 = arith.constant 0 : i32
    %c0_i32_0 = arith.constant 0 : i32
    %c0_i32_1 = arith.constant 0 : i32
    return %c0_i32, %c0_i32_0 : i32, i32
  }
  func.func @transform_10(%arg0: i32) -> (i32, i32) {
    %c0_i32 = arith.constant 0 : i32
    %c0_i32_0 = arith.constant 0 : i32
    %c0_i32_1 = arith.constant 0 : i32
    return %c0_i32, %c0_i32_0 : i32, i32
  }
  func.func @transform_11(%arg0: i32) -> (i32, i32) {
    %c0_i32 = arith.constant 0 : i32
    %c0_i32_0 = arith.constant 0 : i32
    %c0_i32_1 = arith.constant 0 : i32
    return %c0_i32, %c0_i32_0 : i32, i32
  }
  func.func @transform_12(%arg0: i32) -> (i32, i32) {
    %c0_i32 = arith.constant 0 : i32
    %c0_i32_0 = arith.constant 0 : i32
    %c0_i32_1 = arith.constant 0 : i32
    return %c0_i32, %c0_i32_0 : i32, i32
  }
  func.func @transform_13(%arg0: i32) -> (i32, i32) {
    %c0_i32 = arith.constant 0 : i32
    %c0_i32_0 = arith.constant 0 : i32
    return %arg0, %c0_i32 : i32, i32
  }
}

</mosaic_0001>

<bundles_post_ra>
// kernel: tpu_custom_call.1
= control target key start
LH: loop header
LB: loop body
LE: loop exit
PB: predicated region body
PF: predicated region fallthrough
CT: control target
= control target key end

     0   :  { %s3393_s0 = inlined_call_operand.hbm [shape: f32[16,384], index: 0, kind: input, shape index: {}]   ;;  %s3394_s1 = inlined_call_operand.hbm [shape: bf16[384,256], index: 1, kind: input, shape index: {}]   ;;  %s3395_s2 = inlined_call_operand.vmem [shape: f32[1,256], index: 2, kind: input, shape index: {}]   ;;  %s3396_s3 = inlined_call_operand.hbm [shape: bf16[256,128], index: 3, kind: input, shape index: {}]   ;;  %s3397_s4 = inlined_call_operand.vmem [shape: f32[1,128], index: 4, kind: input, shape index: {}]   ;;  %s3398_s5 = inlined_call_operand.hbm [shape: bf16[128,128], index: 5, kind: input, shape index: {}]   ;;  %s3399_s6 = inlined_call_operand.vmem [shape: f32[1,128], index: 6, kind: input, shape index: {}]   ;;  %s3400_s7 = inlined_call_operand.hbm [shape: bf16[128,128], index: 7, kind: input, shape index: {}]   ;;  %s3401_s8 = inlined_call_operand.vmem [shape: f32[1,128], index: 8, kind: input, shape index: {}]   ;;  %s3402_s9 = inlined_call_operand.hbm [shape: bf16[128,256], index: 9, kind: input, shape index: {}]   ;;  %s3403_s10 = inlined_call_operand.vmem [shape: f32[1,256], index: 10, kind: input, shape index: {}]   ;;  %s3404_s11 = inlined_call_operand.hbm [shape: bf16[256,384], index: 11, kind: input, shape index: {}]   ;;  %s3405_s12 = inlined_call_operand.vmem [shape: f32[1,384], index: 12, kind: input, shape index: {}]   ;;  %s3406_s13 = inlined_call_operand.hbm [shape: f32[16,384], index: 13, kind: output, shape index: {}]  }
   0x1   :  { %3416 = sst [smem:[#allocation20_spill]] %s3394_s1 }
   0x2   :  { %3417 = sst [smem:[#allocation21_spill]] %s3396_s3 }
   0x3   :  { %3418 = sst [smem:[#allocation22_spill]] %s3399_s6 }
   0x4   :  { %3419 = sst [smem:[#allocation23_spill]] %s3401_s8 }
   0x5   :  { %3420 = sst [smem:[#allocation24_spill]] %s3403_s10 }
   0x6   :  { %3421 = sst [smem:[#allocation25_spill]] %s3405_s12 }
   0x7   :  { %3422 = sst [smem:[#allocation26_spill]] %s3406_s13 }
   0x8   :  { %18 = vsyncpa [#allocation3], 0 }
   0x9   :  { %20 = vsyncpa [#allocation3 + $0x1], 0 }
   0xa   :  { %21 = vsyncpa [#allocation6], 0 }
   0xb   :  { %22 = vsyncpa [#allocation9], 0 }
   0xc   :  { %23 = vsyncpa [#allocation12], 0 }
   0xd   :  { %24 = vsyncpa [#allocation4], 0 }
   0xe   :  { %26 = vsyncpa [#allocation4 + $0x1], 0  ;;  %s3008_s25 = smov 0   ;;  %s3010_s26 = smov 0  }
   0xf   :  { %s3012_s27 = smov 0   ;;  %s3014_s28 = smov 0  }
  0x10 LB: > { %s2921_s29 = smov [#allocation5]   ;;  %s3029_s14 = sadd.s32 4294967295, %s2919_s28   ;;  %s2919_s28 = sphi %s3014_s28, %s3454_s28   ;;  %s2915_s27 = sphi %s3012_s27, %s3453_s27   ;;  %s2911_s26 = sphi %s3010_s26, %s3452_s26   ;;  %s2907_s25 = sphi %s3008_s25, %s3451_s25  }
  0x11   : > { %s353_s30 = sshll.u32 %s2921_s29, 4  ;;  %p2057_p0 = scmp.ge.s32.totalorder %s2919_s28, 1  ;;  %s3034_s30 = int_to_ptr.vmem [resolvable:$true] %s353_s30 }
  0x12   : > { %p3409_p1 = scmp.eq.s32.totalorder %s3029_s14, 0  ;;  %p341_p2 = scmp.lt.s32.totalorder %s2919_s28, 3 }
  0x13   : > { %s2922_s17 = smov [#allocation8]   ;;  %s2923_s19 = smov [#allocation11]  }
  0x14   : > { %p3036_p3 = pnand %p2057_p0, %p341_p2  ;;  %s385_s18 = sshll.u32 %s2922_s17, 4  ;;  %s3049_s18 = int_to_ptr.vmem [resolvable:$true] %s385_s18 }
  0x15   : > { %s3051_s20 = sshll.u32 %s2923_s19, 4  ;;  %s3425_s1 = sld [smem:[#allocation20_spill]]  ;;  %s418_s20 = int_to_ptr.vmem [resolvable:$true] %s3051_s20 }
  0x16   : > { %s3423_s15 = scalar_select %p3036_p3, 1, 0 }
  0x17   : > { %p2363_p5 = pneg %p3036_p3 }
  0x19   : > { %p3045_p6 = pnand %p2363_p5, %p3409_p1 }
  0x1b   : > { %s2643_s23 = scalar_lea.hbm %s3425_s1, 6144  ;;  %p3061_p8 = pneg %p3045_p6 }
  0x1c   : > { %p2644_p7 = scmp.ne.s32.totalorder %s3425_s1, %s2643_s23  ;;  %p2650_p11 = scmp.lt.u32.totalorder %s2643_s23, %s3425_s1 }
  0x1e   : > { %p2646_p9 = pnand %p3061_p8, %p2644_p7 }
  0x20   : > { %p2647_p10 = pneg %p2646_p9 }
  0x22   : > { %p2652_p12 = pnand %p2650_p11, %p2647_p10 }
  0x24   : > { %2655 = shalt.err (!%p2652_p12)
}
  0x25   : > { %s2656_s21 = scalar_lea.vmem %s3034_s30, 6144  ;;  %p2664_p5 = scmp.lt.s32.totalorder %s3034_s30, %s3034_s30 }
  0x26   : > { %p2657_p13 = scmp.ne.s32.totalorder %s3034_s30, %s2656_s21  ;;  %p2665_p4 = scmp.lt.s32.totalorder %s2656_s21, %s2656_s21 }
  0x28   : > { %p2659_p0 = pnand %p2657_p13, %p3061_p8  ;;  %p2666_p7 = por %p2665_p4, %p2664_p5 }
  0x2a   : > { %p2660_p2 = pneg %p2659_p0 }
  0x2c   : > { %p2667_p9 = pnand %p2666_p7, %p2660_p2 }
  0x2e   : > { %2670 = shalt.err (!%p2667_p9)
}
  0x2f   : > { %s3408_s22 = smov 128   ;;  %s2925_s23 = smov 8  }
  0x30   : > { %2366 = dma.hbm_to_vmem [thread:$0]  (!%p3045_p6), %s3425_s1, 6144, %s3034_s30, [#allocation6], %s3408_s22, %s3408_s22, %s2925_s23  }
  0x31   : > { %s2671_s21 = scalar_lea.hbm %s3398_s5, 1024 }
  0x32   : > { %p2672_p4 = scmp.ne.s32.totalorder %s3398_s5, %s2671_s21  ;;  %p2678_p12 = scmp.lt.u32.totalorder %s2671_s21, %s3398_s5 }
  0x34   : > { %p2674_p10 = pnand %p2672_p4, %p3061_p8 }
  0x36   : > { %p2675_p11 = pneg %p2674_p10 }
  0x38   : > { %p2680_p13 = pnand %p2678_p12, %p2675_p11 }
  0x3a   : > { %2683 = shalt.err (!%p2680_p13)
}
  0x3b   : > { %s2684_s30 = scalar_lea.vmem %s3049_s18, 1024  ;;  %p2692_p7 = scmp.lt.s32.totalorder %s3049_s18, %s3049_s18 }
  0x3c   : > { %p2685_p0 = scmp.ne.s32.totalorder %s3049_s18, %s2684_s30  ;;  %p2693_p9 = scmp.lt.s32.totalorder %s2684_s30, %s2684_s30 }
  0x3e   : > { %p2687_p2 = pnand %p2685_p0, %p3061_p8  ;;  %p2694_p4 = por %p2693_p9, %p2692_p7 }
  0x40   : > { %p2688_p5 = pneg %p2687_p2 }
  0x42   : > { %p2695_p10 = pnand %p2694_p4, %p2688_p5 }
  0x44   : > { %2698 = shalt.err (!%p2695_p10)
}
  0x45   : > { %s3411_s10 = smov 64   ;;  %s3413_s6 = smov 4  }
  0x46   : > { %2372 = dma.hbm_to_vmem [thread:$0]  (!%p3045_p6), %s3398_s5, 1024, %s3049_s18, [#allocation9], %s3411_s10, %s3411_s10, %s3413_s6  }
  0x47   : > { %s2699_s17 = scalar_lea.hbm %s3402_s9, 2048 }
  0x48   : > { %p2700_p11 = scmp.ne.s32.totalorder %s3402_s9, %s2699_s17  ;;  %p2706_p0 = scmp.lt.u32.totalorder %s2699_s17, %s3402_s9 }
  0x4a   : > { %p2702_p12 = pnand %p2700_p11, %p3061_p8 }
  0x4c   : > { %p2703_p13 = pneg %p2702_p12 }
  0x4e   : > { %p2708_p2 = pnand %p2706_p0, %p2703_p13 }
  0x50   : > { %2711 = shalt.err (!%p2708_p2)
}
  0x51   : > { %s2712_s8 = scalar_lea.vmem %s418_s20, 2048  ;;  %p2720_p4 = scmp.lt.s32.totalorder %s418_s20, %s418_s20 }
  0x52   : > { %p2713_p5 = scmp.ne.s32.totalorder %s418_s20, %s2712_s8  ;;  %p2721_p10 = scmp.lt.s32.totalorder %s2712_s8, %s2712_s8 }
  0x54   : > { %p2715_p7 = pnand %p2713_p5, %p3061_p8  ;;  %p2722_p1 = por %p2721_p10, %p2720_p4 }
  0x56   : > { %p2716_p9 = pneg %p2715_p7 }
  0x58   : > { %p2723_p3 = pnand %p2722_p1, %p2716_p9 }
  0x5a   : > { %2726 = shalt.err (!%p2723_p3)
}
  0x5b   : > { %s3427_s18 = smov 128   ;;  %s2928_s24 = smov [#allocation7]  }
  0x5c   : > { %2378 = dma.hbm_to_vmem [thread:$0]  (!%p3045_p6), %s3402_s9, 2048, %s418_s20, [#allocation12], %s3427_s18, %s3427_s18, %s2925_s23  }
  0x5d   : > { %s369_s29 = sshll.u32 %s2928_s24, 4  ;;  %s2929_s17 = smov [#allocation10]   ;;  %s370_s29 = int_to_ptr.vmem [resolvable:$true] %s369_s29 }
  0x5e   : > { %s401_s19 = sshll.u32 %s2929_s17, 4  ;;  %s3428_s3 = sld [smem:[#allocation21_spill]]  ;;  %s402_s19 = int_to_ptr.vmem [resolvable:$true] %s401_s19 }
  0x64   : > { %s2727_s8 = scalar_lea.hbm %s3428_s3, 2048 }
  0x65   : > { %p2728_p1 = scmp.ne.s32.totalorder %s3428_s3, %s2727_s8  ;;  %p2734_p12 = scmp.lt.u32.totalorder %s2727_s8, %s3428_s3 }
  0x67   : > { %p2730_p3 = pnand %p2728_p1, %p3061_p8 }
  0x69   : > { %p2731_p11 = pneg %p2730_p3 }
  0x6b   : > { %p2736_p13 = pnand %p2734_p12, %p2731_p11 }
  0x6d   : > { %2739 = shalt.err (!%p2736_p13)
}
  0x6e   : > { %s2740_s20 = scalar_lea.vmem %s370_s29, 2048  ;;  %p2748_p7 = scmp.lt.s32.totalorder %s370_s29, %s370_s29 }
  0x6f   : > { %p2741_p0 = scmp.ne.s32.totalorder %s370_s29, %s2740_s20  ;;  %p2749_p9 = scmp.lt.s32.totalorder %s2740_s20, %s2740_s20 }
  0x71   : > { %p2743_p2 = pnand %p2741_p0, %p3061_p8  ;;  %p2750_p4 = por %p2749_p9, %p2748_p7 }
  0x73   : > { %p2744_p5 = pneg %p2743_p2 }
  0x75   : > { %p2751_p10 = pnand %p2750_p4, %p2744_p5 }
  0x77   : > { %2754 = shalt.err (!%p2751_p10)
}
  0x78   : > { %s3429_s23 = smov 4   ;;  %s3430_s10 = smov 64  }
  0x79   : > { %2369 = dma.hbm_to_vmem [thread:$0]  (!%p3045_p6), %s3428_s3, 2048, %s370_s29, [#allocation6], %s3430_s10, %s3430_s10, %s3429_s23  }
  0x7a   : > { %s2755_s24 = scalar_lea.hbm %s3400_s7, 1024 }
  0x7b   : > { %p2756_p1 = scmp.ne.s32.totalorder %s3400_s7, %s2755_s24  ;;  %p2762_p12 = scmp.lt.u32.totalorder %s2755_s24, %s3400_s7 }
  0x7d   : > { %p2758_p3 = pnand %p2756_p1, %p3061_p8 }
  0x7f   : > { %p2759_p11 = pneg %p2758_p3 }
  0x81   : > { %p2764_p13 = pnand %p2762_p12, %p2759_p11 }
  0x83   : > { %2767 = shalt.err (!%p2764_p13)
}
  0x84   : > { %s2768_s22 = scalar_lea.vmem %s402_s19, 1024  ;;  %p2776_p7 = scmp.lt.s32.totalorder %s402_s19, %s402_s19 }
  0x85   : > { %p2769_p0 = scmp.ne.s32.totalorder %s402_s19, %s2768_s22  ;;  %p2777_p9 = scmp.lt.s32.totalorder %s2768_s22, %s2768_s22 }
  0x87   : > { %p2771_p2 = pnand %p2769_p0, %p3061_p8  ;;  %p2778_p4 = por %p2777_p9, %p2776_p7 }
  0x89   : > { %p2772_p5 = pneg %p2771_p2 }
  0x8b   : > { %p2779_p10 = pnand %p2778_p4, %p2772_p5 }
  0x8d   : > { %2782 = shalt.err (!%p2779_p10)
}
  0x8e   : > { %2375 = dma.hbm_to_vmem [thread:$0]  (!%p3045_p6), %s3400_s7, 1024, %s402_s19, [#allocation9], %s3430_s10, %s3430_s10, %s3429_s23  }
  0x8f   : > { %s2930_s1 = smov [#allocation13]   ;;  %s2783_s24 = scalar_lea.hbm %s3404_s11, 6144 }
  0x90   : > { %s433_s6 = sshll.u32 %s2930_s1, 4  ;;  %p2784_p1 = scmp.ne.s32.totalorder %s3404_s11, %s2783_s24  ;;  %s434_s6 = int_to_ptr.vmem [resolvable:$true] %s433_s6 }
  0x91   : > { %p2790_p12 = scmp.lt.u32.totalorder %s2783_s24, %s3404_s11 }
  0x92   : > { %p2786_p3 = pnand %p2784_p1, %p3061_p8 }
  0x94   : > { %p2787_p11 = pneg %p2786_p3 }
  0x96   : > { %p2792_p13 = pnand %p2790_p12, %p2787_p11 }
  0x98   : > { %2795 = shalt.err (!%p2792_p13)
}
  0x99   : > { %s2796_s19 = scalar_lea.vmem %s434_s6, 6144  ;;  %p2804_p7 = scmp.lt.s32.totalorder %s434_s6, %s434_s6 }
  0x9a   : > { %p2797_p0 = scmp.ne.s32.totalorder %s434_s6, %s2796_s19  ;;  %p2805_p9 = scmp.lt.s32.totalorder %s2796_s19, %s2796_s19 }
  0x9c   : > { %p2799_p2 = pnand %p2797_p0, %p3061_p8  ;;  %p2806_p4 = por %p2805_p9, %p2804_p7 }
  0x9e   : > { %p2800_p5 = pneg %p2799_p2 }
  0xa0   : > { %p2807_p10 = pnand %p2806_p4, %p2800_p5 }
  0xa2   : > { %2810 = shalt.err (!%p2807_p10)
}
  0xa3   : > { %s2931_s23 = smov 192   ;;  %s2932_s13 = smov 12  }
  0xa4   : > { %2381 = dma.hbm_to_vmem [thread:$0]  (!%p3045_p6), %s3404_s11, 6144, %s434_s6, [#allocation12], %s2931_s23, %s2931_s23, %s2932_s13  }
  0xa5   : > { %s2056_s29 = sadd.s32 4294967294, %s2919_s28   ;;  %s3195_s20 = sadd.s32 1, %s2919_s28  }
  0xa6   : > { %s36_s1 = ssub.s32 %s2919_s28, %s3195_s20  ;;  %s39_s18 = sadd.s32 1, %s2915_s27 }
  0xa7   : > { %p37_p8 = scmp.eq.s32.totalorder %s36_s1, 0  ;;  %p46_p1 = scmp.ne.s32.totalorder %s2915_s27, %s2911_s26 }
  0xa8   : > { %p47_p3 = scmp.eq.s32.totalorder %s2919_s28, 0  ;;  %p52_p11 = scmp.ne.s32.totalorder %s2911_s26, %s2907_s25 }
  0xa9   : > { %s3206_s12 = scalar_select %p37_p8, %s2915_s27, %s39_s18  }
  0xaa   : > { %p48_p12 = por %p47_p3, %p46_p1  ;;  %p3431_p13 = scmp.eq.s32.totalorder %s3029_s14, 0 }
  0xab   : > { %p328_p6 = scmp.eq.s32.totalorder %s3029_s14, 1  ;;  %p334_p2 = scmp.eq.s32.totalorder %s2056_s29, 1 }
  0xac   : > { %p3210_p0 = por %p3431_p13, %p52_p11  ;;  %p2396_p5 = scmp.lt.s32.totalorder %s2919_s28, 2 }
  0xad   : > { %s450_s6 = sand.u32 1, %s2915_s27   ;;  %p3217_p7 = por %p328_p6, %p46_p1 }
  0xae   : > { %p3221_p9 = por %p334_p2, %p52_p11  ;;  %s2331_s21 = smul.u32 24, %s450_s6 }
  0xaf   : > { %s3433_s24 = scalar_select %p3217_p7, 1, 0 }
  0xb0   : > { %s3434_s17 = scalar_select %p3221_p9, 1, 0 }
  0xb1   : > { %s2332_s30 = smul.u32 384, %s2919_s28  ;;  %p3226_p4 = pnand %p2396_p5, %p48_p12 }
  0xb2   : > { %s454_s10 = scalar_lea.vmem [#allocation2], %s2331_s21  ;;  %s451_s29 = scalar_lea.sflag [#allocation3], %s450_s6 }
  0xb3   : > { %s3233_s13 = scalar_lea.hbm %s3393_s0, %s2332_s30  ;;  %s462_s22 = sshll.u32 %s454_s10, 4  ;;  %s3235_s22 = int_to_ptr.vmem [resolvable:$true] %s462_s22 }
  0xb4   : > { %s2811_s1 = scalar_lea.hbm %s3233_s13, 384  ;;  %p2813_p8 = pneg %p3226_p4 }
  0xb5   : > { %p2812_p10 = scmp.ne.s32.totalorder %s3233_s13, %s2811_s1  ;;  %s2816_s19 = scalar_lea.hbm %s3393_s0, 768 }
  0xb6   : > { %p2817_p11 = scmp.lt.u32.totalorder %s3233_s13, %s3393_s0  ;;  %p2818_p12 = scmp.lt.u32.totalorder %s2816_s19, %s2811_s1 }
  0xb7   : > { %p2814_p1 = pnand %p2813_p8, %p2812_p10  ;;  %p2820_p6 = scmp.lt.u32.totalorder %s2811_s1, %s3233_s13 }
  0xb8   : > { %p2819_p13 = por %p2818_p12, %p2817_p11 }
  0xb9   : > { %p2815_p3 = pneg %p2814_p1 }
  0xba   : > { %p2821_p2 = por %p2820_p6, %p2819_p13 }
  0xbc   : > { %p2822_p5 = pnand %p2821_p2, %p2815_p3 }
  0xbe   : > { %2825 = shalt.err (!%p2822_p5)
}
  0xbf   : > { %s2826_s6 = scalar_lea.vmem %s3235_s22, 384  ;;  %s2933_s21 = smov [#allocation2]  }
  0xc0   : > { %p2827_p10 = scmp.ne.s32.totalorder %s3235_s22, %s2826_s6  ;;  %s2831_s10 = sshll.u32 %s2933_s21, 4  ;;  %s2832_s10 = int_to_ptr.vmem [resolvable:$false] %s2831_s10 }
  0xc1   : > { %s2833_s3 = scalar_lea.vmem %s2832_s10, 768  ;;  %p2834_p7 = scmp.lt.s32.totalorder %s3235_s22, %s2832_s10 }
  0xc2   : > { %p2829_p1 = pnand %p2827_p10, %p2813_p8  ;;  %p2835_p11 = scmp.lt.s32.totalorder %s2833_s3, %s2826_s6 }
  0xc4   : > { %p2830_p9 = pneg %p2829_p1  ;;  %p2836_p12 = por %p2835_p11, %p2834_p7 }
  0xc6   : > { %p2837_p13 = pnand %p2836_p12, %p2830_p9 }
  0xc8   : > { %2840 = shalt.err (!%p2837_p13)
}
  0xc9   : > { %2385 = dma.hbm_to_vmem [thread:$0]  (!%p3226_p4), %s3233_s13, 384, %s3235_s22, %s451_s29  }
  0xca   : > { %p3436_p3 = scmp.ne.s32.totalorder %s3423_s15, 0 }
  0xcb   : > { %s3265_s1 = sand.u32 (!%p3436_p3), 1, %s2911_s26  }
  0xcc   : > { %471 = sbr.rel (%p3436_p3) target bundleno = 1646 (0x66e), region = 72  ;;  %s474_s30 = scalar_lea.sflag (!%p3436_p3), [#allocation3], %s3265_s1 }
  0xcd   : > { %s2333_s18 = smul.u32 (!%p3436_p3), 24, %s3265_s1 }
  0xcf   : > { %s3271_s19 = scalar_lea.vmem (!%p3436_p3), [#allocation2], %s2333_s18 }
  0xd3   : > { %2886 = dma.done.wait (%p3210_p0), %s474_s30, 384  }
  0xd4   : > { %2888 = vsyncadd (%p3210_p0), %s474_s30, 4294966912  ;;  %p3437_p7 = scmp.eq.s32.totalorder %s3029_s14, 0 }
  0xd6   : > { %2890 = dma.done.wait (%p3437_p7), [#allocation6], 8192   ;;  %p3438_p9 = pmov %p3437_p7 }
  0xd7   : > { %p3439_p4 = pmov %p3437_p7 }
  0xd8   : > { %2892 = vsyncadd (%p3438_p9), [#allocation6], 4294959104 }
  0xd9   : > { %2894 = dma.done.wait (%p3439_p4), [#allocation9], 2048   ;;  %p3440_p8 = pmov %p3439_p4 }
  0xda   : > { %p3441_p6 = pmov %p3439_p4 }
  0xdb   : > { %2896 = vsyncadd (%p3440_p8), [#allocation9], 4294965248 }
  0xdc   : > { %2898 = dma.done.wait (%p3441_p6), [#allocation12], 8192   ;;  %p3442_p2 = pmov %p3439_p4 }
  0xdd   : > { %v2451_v0 = vld [vmem:[#allocation5 + $0x4] ss:$8 sps:$4 sm:$0xff]   ;;  %v2453_v1 = vld [vmem:[#allocation5] ss:$8 sps:$4 sm:$0xff]   ;;  %v2454_v2 = vld [vmem:[#allocation5 + $0x14] ss:$8 sps:$4 sm:$0xff]  }
  0xde   : > { %2900 = vsyncadd (%p3442_p2), [#allocation12], 4294959104  ;;  %851 = vmatprep.subr.bf16.mxu0 %v2451_v0  ;;  %v2456_v3 = vld [vmem:[#allocation5 + $0x10] ss:$8 sps:$4 sm:$0xff]   ;;  %v2457_v4 = vld [vmem:[#allocation5 + $0x24] ss:$8 sps:$4 sm:$0xff]  }
  0xdf   : > { %852 = vmatpush1.bf16.msra.mxu0 %v2453_v1  ;;  %v2459_v5 = vld [vmem:[#allocation5 + $0x20] ss:$8 sps:$4 sm:$0xff]   ;;  %v2460_v6 = vld [vmem:[#allocation5 + $0x34] ss:$8 sps:$4 sm:$0xff]   ;;  %v2462_v7 = vld [vmem:[#allocation5 + $0x30] ss:$8 sps:$4 sm:$0xff]  }
  0xe0   : > { %853 = vmatprep.subr.bf16.mxu0 %v2454_v2  ;;  %v2463_v8 = vld [vmem:[#allocation5 + $0x44] ss:$8 sps:$4 sm:$0xff]   ;;  %v2465_v9 = vld [vmem:[#allocation5 + $0x40] ss:$8 sps:$4 sm:$0xff]   ;;  %v2466_v10 = vld [vmem:[#allocation5 + $0x54] ss:$8 sps:$4 sm:$0xff]  }
  0xe1   : > { %v2468_v11 = vld [vmem:[#allocation5 + $0x50] ss:$8 sps:$4 sm:$0xff]   ;;  %v2469_v12 = vld [vmem:[#allocation5 + $0x64] ss:$8 sps:$4 sm:$0xff]   ;;  %v2471_v15 = vld [vmem:[#allocation5 + $0x60] ss:$8 sps:$4 sm:$0xff]  }
  0xe2   : > { %v546_v13 = vld [vmem:[%s3271_s19 + $0x8] sm:$0xff]  ;;  %v2475_v18 = vld [vmem:[#allocation5 + $0x84] ss:$8 sps:$4 sm:$0xff]   ;;  %v2477_v19 = vld [vmem:[#allocation5 + $0x80] ss:$8 sps:$4 sm:$0xff]   ;;  %v2934_v53 = vmov 0  }
  0xe3   : > { %854 = vmatpush1.bf16.msra.mxu0 %v2456_v3  ;;  %v597_v14 = vpack.c.bf16 %v546_v13, %v546_v13  ;;  %v2472_v16 = vld [vmem:[#allocation5 + $0x74] ss:$8 sps:$4 sm:$0xff]   ;;  %v2474_v17 = vld [vmem:[#allocation5 + $0x70] ss:$8 sps:$4 sm:$0xff]   ;;  %v2523_v22 = vld [vmem:[#allocation7 + $0x40] sm:$0xff]   ;;  %vm2936_vm0 = vmmov 0  }
  0xe4   : > { %855 = vmatprep.subr.bf16.mxu0 %v2457_v4  ;;  %v2478_v20 = vld [vmem:[#allocation5 + $0x94] ss:$8 sps:$4 sm:$0xff]   ;;  %v2480_v21 = vld [vmem:[#allocation5 + $0x90] ss:$8 sps:$4 sm:$0xff]   ;;  %v2481_v23 = vld [vmem:[#allocation5 + $0xa4] ss:$8 sps:$4 sm:$0xff]   ;;  %2223 = vmatprep.subr.bf16.mxu1 %v2523_v22 }
  0xe5   : > { %883 = vmatprep.mubr.bf16.mxu0 %v597_v14  ;;  %v2524_v24 = vld [vmem:[#allocation7] sm:$0xff]   ;;  %v2525_v25 = vld [vmem:[#allocation7 + $0x48] sm:$0xff]   ;;  %v2527_v27 = vld [vmem:[#allocation7 + $0x50] sm:$0xff]   ;;  %s3443_s23 = sld [smem:[#allocation22_spill]]  ;;  %s3444_s10 = sld [smem:[#allocation23_spill]] }
  0xe6   : > { %2224 = vmatpush3.bf16.msra.mxu1 %v2524_v24  ;;  %v2526_v26 = vld [vmem:[#allocation7 + $0x8] sm:$0xff]   ;;  %v2484_v29 = vld [vmem:[#allocation5 + $0xb4] ss:$8 sps:$4 sm:$0xff]   ;;  %v2486_v32 = vld [vmem:[#allocation5 + $0xb0] ss:$8 sps:$4 sm:$0xff]   ;;  %s3446_s8 = sld [smem:[#allocation25_spill]] }
  0xe7   : > { %856 = vmatpush1.bf16.msra.mxu0 %v2459_v5  ;;  %2225 = vmatprep.subr.bf16.mxu1 %v2525_v25  ;;  %v2483_v28 = vld [vmem:[#allocation5 + $0xa0] ss:$8 sps:$4 sm:$0xff]   ;;  %v2528_v30 = vld [vmem:[#allocation7 + $0x10] sm:$0xff]   ;;  %v2529_v31 = vld [vmem:[#allocation7 + $0x58] sm:$0xff]   ;;  %s2334_s13 = smul.u32 384, %s3029_s14  ;;  %s543_s22 = scalar_lea.vmem [#allocation14], %s2333_s18 }
  0xe8   : > { %857 = vmatprep.subr.bf16.mxu0 %v2460_v6  ;;  %v2487_v33 = vld [vmem:[#allocation5 + $0xc4] ss:$8 sps:$4 sm:$0xff]   ;;  %v2530_v34 = vld [vmem:[#allocation7 + $0x18] sm:$0xff]   ;;  %v2489_v35 = vld [vmem:[#allocation5 + $0xc0] ss:$8 sps:$4 sm:$0xff]   ;;  %s1929_s29 = sshll.u32 %s543_s22, 4  ;;  %s3351_s29 = int_to_ptr.vmem [resolvable:$true] %s1929_s29 }
  0xe9   : > { %v2531_v36 = vld [vmem:[#allocation7 + $0x60] sm:$0xff]   ;;  %v2490_v37 = vld [vmem:[#allocation5 + $0xd4] ss:$8 sps:$4 sm:$0xff]   ;;  %v2533_v39 = vld [vmem:[#allocation7 + $0x68] sm:$0xff]   ;;  %s3447_s14 = sld [smem:[#allocation26_spill]]  ;;  %s1915_s18 = scalar_lea.sflag [#allocation4], %s3265_s1 }
  0xea   : > { %2226 = vmatpush3.bf16.msra.mxu1 %v2526_v26  ;;  %v2532_v38 = vld [vmem:[#allocation7 + $0x20] sm:$0xff]   ;;  %v2492_v40 = vld [vmem:[#allocation5 + $0xd0] ss:$8 sps:$4 sm:$0xff]   ;;  %v2534_v42 = vld [vmem:[#allocation7 + $0x28] sm:$0xff]   ;;  %p3448_p5 = scmp.ne.s32.totalorder %s3433_s24, 0  ;;  %s2937_s3 = smov [#allocation14]  }
  0xeb   : > { %858 = vmatpush1.bf16.msra.mxu0 %v2462_v7  ;;  %2227 = vmatprep.subr.bf16.mxu1 %v2527_v27  ;;  %v2493_v41 = vld [vmem:[#allocation5 + $0xe4] ss:$8 sps:$4 sm:$0xff]   ;;  %v2495_v43 = vld [vmem:[#allocation5 + $0xe0] ss:$8 sps:$4 sm:$0xff]   ;;  %v2496_v44 = vld [vmem:[#allocation5 + $0xf4] ss:$8 sps:$4 sm:$0xff]  }
  0xec   : > { %859 = vmatprep.subr.bf16.mxu0 %v2463_v8  ;;  %v2498_v45 = vld [vmem:[#allocation5 + $0xf0] ss:$8 sps:$4 sm:$0xff]   ;;  %v2501_v47 = vld [vmem:[#allocation5 + $0x104] ss:$8 sps:$4 sm:$0xff]   ;;  %v2499_v48 = vld [vmem:[#allocation5 + $0x100] ss:$8 sps:$4 sm:$0xff]   ;;  %v601_v8 = vlaneseq }
  0xed   : > { %v545_v46 = vld [vmem:[%s3271_s19] sm:$0xff]  ;;  %v547_v1 = vld [vmem:[%s3271_s19 + $0x10] sm:$0xff]  ;;  %v2935_v7 = vmov 0.0   ;;  %s3445_s19 = sld [smem:[#allocation24_spill]]  ;;  %s2845_s30 = sshll.u32 %s2937_s3, 4  ;;  %s2846_s30 = int_to_ptr.vmem [resolvable:$false] %s2845_s30 }
  0xee   : > { %2228 = vmatpush3.bf16.msra.mxu1 %v2528_v30  ;;  %v596_v49 = vpack.c.bf16 %v545_v46, %v545_v46  ;;  %v2504_v50 = vld [vmem:[#allocation5 + $0x114] ss:$8 sps:$4 sm:$0xff]   ;;  %v2502_v51 = vld [vmem:[#allocation5 + $0x110] ss:$8 sps:$4 sm:$0xff]   ;;  %v2507_v52 = vld [vmem:[#allocation5 + $0x124] ss:$8 sps:$4 sm:$0xff]   ;;  %v598_v2 = vpack.c.bf16 %v547_v1, %v547_v1  ;;  %p2848_p11 = scmp.lt.s32.totalorder %s3351_s29, %s2846_s30 }
  0xef   : > { %860 = vmatpush1.bf16.msra.mxu0 %v2465_v9  ;;  %2229 = vmatprep.subr.bf16.mxu1 %v2529_v31  ;;  %v2505_v54 = vld [vmem:[#allocation5 + $0x120] ss:$8 sps:$4 sm:$0xff]   ;;  %v2510_v55 = vld [vmem:[#allocation5 + $0x134] ss:$8 sps:$4 sm:$0xff]   ;;  %v2508_v56 = vld [vmem:[#allocation5 + $0x130] ss:$8 sps:$4 sm:$0xff]   ;;  %s3349_s21 = scalar_lea.hbm %s3447_s14, %s2334_s13 }
  0xf0   : > { %861 = vmatprep.subr.bf16.mxu0 %v2466_v10  ;;  %v2513_v57 = vld [vmem:[#allocation5 + $0x144] ss:$8 sps:$4 sm:$0xff]   ;;  %v2511_v58 = vld [vmem:[#allocation5 + $0x140] ss:$8 sps:$4 sm:$0xff]   ;;  %v2516_v59 = vld [vmem:[#allocation5 + $0x154] ss:$8 sps:$4 sm:$0xff]  }
  0xf1   : > { %v2514_v60 = vld [vmem:[#allocation5 + $0x150] ss:$8 sps:$4 sm:$0xff]   ;;  %v2519_v61 = vld [vmem:[#allocation5 + $0x164] ss:$8 sps:$4 sm:$0xff]   ;;  %v2517_v62 = vld [vmem:[#allocation5 + $0x160] ss:$8 sps:$4 sm:$0xff]  }
  0xf2   : > { %2230 = vmatpush3.bf16.msra.mxu1 %v2530_v34  ;;  %v2522_v63 = vld [vmem:[#allocation5 + $0x174] ss:$8 sps:$4 sm:$0xff]   ;;  %v2520_v0 = vld [vmem:[#allocation5 + $0x170] ss:$8 sps:$4 sm:$0xff]   ;;  %v3293_v9 = vshrl.u32 %v601_v8, 7  ;;  %v2539_v24 = vld [vmem:[#allocation8] sm:$0xff]  }
  0xf3   : > { %862 = vmatpush1.bf16.msra.mxu0 %v2468_v11  ;;  %2231 = vmatprep.subr.bf16.mxu1 %v2531_v36  ;;  %v2535_v3 = vld [vmem:[#allocation7 + $0x70] sm:$0xff]   ;;  %v2537_v5 = vld [vmem:[#allocation7 + $0x78] sm:$0xff]   ;;  %v2540_v26 = vld [vmem:[#allocation8 + $0x8] sm:$0xff]  }
  0xf4   : > { %863 = vmatprep.subr.bf16.mxu0 %v2469_v12  ;;  %v2536_v4 = vld [vmem:[#allocation7 + $0x30] sm:$0xff]   ;;  %v2538_v6 = vld [vmem:[#allocation7 + $0x38] sm:$0xff]   ;;  %v3296_v10 = vsub.s32 0, %v3293_v9  ;;  %v3302_v12 = vsub.s32 1, %v3293_v9  ;;  %v2544_v30 = vld [vmem:[#allocation8 + $0x28] sm:$0xff]  }
  0xf5   : > { %v599_v11 = vld [vmem:[%s3395_s2] sm:$0x3]  ;;  %v2551_v46 = vld [vmem:[#allocation10 + $0x20] sm:$0xff]   ;;  %v2578_v8 = vld [vmem:[#allocation11 + $0x74] ss:$8 sps:$4 sm:$0xff]  }
  0xf6   : > { %2232 = vmatpush3.bf16.msra.mxu1 %v2532_v38  ;;  %v604_v13 = vrot.slane %v599_v11, %v3296_v10  ;;  %v608_v14 = vrot.slane %v599_v11, %v3302_v12  ;;  %v2541_v27 = vld [vmem:[#allocation8 + $0x10] sm:$0xff]  }
  0xf7   : > { %864 = vmatpush1.bf16.msra.mxu0 %v2471_v15  ;;  %2233 = vmatprep.subr.bf16.mxu1 %v2533_v39  ;;  %v2545_v31 = vld [vmem:[#allocation8 + $0x30] sm:$0xff]  }
  0xf8   : > { %865 = vmatprep.subr.bf16.mxu0 %v2472_v16  ;;  %v2121_v34 = vld [vmem:[%s3397_s4] ss:$0 sm:$0xff] }
  0xf9   : > { %v2576_v11 = vld [vmem:[#allocation11 + $0x70] ss:$8 sps:$4 sm:$0xff]  }
  0xfa   : > { %2234 = vmatpush3.bf16.msra.mxu1 %v2534_v42 }
  0xfb   : > { %866 = vmatpush1.bf16.msra.mxu0 %v2474_v17  ;;  %2235 = vmatprep.subr.bf16.mxu1 %v2535_v3 }
  0xfc   : > { %867 = vmatprep.subr.bf16.mxu0 %v2475_v18 }
  0xfe   : > { %2236 = vmatpush3.bf16.msra.mxu1 %v2536_v4 }
  0xff   : > { %868 = vmatpush1.bf16.msra.mxu0 %v2477_v19  ;;  %2237 = vmatprep.subr.bf16.mxu1 %v2537_v5 }
 0x100   : > { %869 = vmatprep.subr.bf16.mxu0 %v2478_v20 }
 0x102   : > { %2238 = vmatpush3.bf16.msra.mxu1 %v2538_v6 }
 0x103   : > { %870 = vmatpush1.bf16.msra.mxu0 %v2480_v21  ;;  %2285 = vmatprep.subr.bf16.mxu1 %v2935_v7 }
 0x104   : > { %871 = vmatprep.subr.bf16.mxu0 %v2481_v23 }
 0x107   : > { %872 = vmatpush1.bf16.msra.mxu0 %v2483_v28  ;;  %v2542_v28 = vld [vmem:[#allocation8 + $0x18] sm:$0xff]  }
 0x108   : > { %873 = vmatprep.subr.bf16.mxu0 %v2484_v29  ;;  %v2543_v29 = vld [vmem:[#allocation8 + $0x20] sm:$0xff]  }
 0x10b   : > { %874 = vmatpush1.bf16.msra.mxu0 %v2486_v32  ;;  %v2546_v32 = vld [vmem:[#allocation8 + $0x38] sm:$0xff]  }
 0x10c   : > { %875 = vmatprep.subr.bf16.mxu0 %v2487_v33 }
 0x10f   : > { %876 = vmatpush1.bf16.msra.mxu0 %v2489_v35 }
 0x110   : > { %877 = vmatprep.subr.bf16.mxu0 %v2490_v37 }
 0x113   : > { %878 = vmatpush1.bf16.msra.mxu0 %v2492_v40 }
 0x114   : > { %879 = vmatprep.subr.bf16.mxu0 %v2493_v41  ;;  %v2547_v41 = vld [vmem:[#allocation10] sm:$0xff]  }
 0x117   : > { %880 = vmatpush1.bf16.msra.mxu0 %v2495_v43  ;;  %v2548_v43 = vld [vmem:[#allocation10 + $0x8] sm:$0xff]  }
 0x118   : > { %881 = vmatprep.subr.bf16.mxu0 %v2496_v44  ;;  %v2549_v44 = vld [vmem:[#allocation10 + $0x10] sm:$0xff]  }
 0x11b   : > { %882 = vmatpush1.bf16.msra.mxu0 %v2498_v45  ;;  %v2550_v45 = vld [vmem:[#allocation10 + $0x18] sm:$0xff]  }
 0x11c   : > { %892 = vmatprep.subr.bf16.mxu0 %v2501_v47  ;;  %v2552_v47 = vld [vmem:[#allocation10 + $0x28] sm:$0xff]  }
 0x11e   : > { %884 = vmatmul.mubr.bf16.vlgmr.msra.gmra.mrb[0].mxu0 %v596_v49  ;;  %v2554_v49 = vld [vmem:[#allocation10 + $0x38] sm:$0xff]  }
 0x11f   : > { %893 = vmatpush1.bf16.msra.mxu0 %v2499_v48  ;;  %924 = vmatprep.mubr.bf16.mxu0 %v2934_v53  ;;  %v2553_v48 = vld [vmem:[#allocation10 + $0x30] sm:$0xff]  }
 0x120   : > { %894 = vmatprep.subr.bf16.mxu0 %v2504_v50  ;;  %v2555_v50 = vld [vmem:[#allocation11] ss:$8 sps:$4 sm:$0xff]  }
 0x123   : > { %895 = vmatpush1.bf16.msra.mxu0 %v2502_v51  ;;  %v2557_v51 = vld [vmem:[#allocation11 + $0x4] ss:$8 sps:$4 sm:$0xff]  }
 0x124   : > { %896 = vmatprep.subr.bf16.mxu0 %v2507_v52  ;;  %v2560_v52 = vld [vmem:[#allocation11 + $0x14] ss:$8 sps:$4 sm:$0xff]  }
 0x127   : > { %897 = vmatpush1.bf16.msra.mxu0 %v2505_v54  ;;  %v2563_v54 = vld [vmem:[#allocation11 + $0x24] ss:$8 sps:$4 sm:$0xff]  }
 0x128   : > { %898 = vmatprep.subr.bf16.mxu0 %v2510_v55  ;;  %v2561_v55 = vld [vmem:[#allocation11 + $0x20] ss:$8 sps:$4 sm:$0xff]  }
 0x12b   : > { %899 = vmatpush1.bf16.msra.mxu0 %v2508_v56  ;;  %v2566_v56 = vld [vmem:[#allocation11 + $0x34] ss:$8 sps:$4 sm:$0xff]  }
 0x12c   : > { %900 = vmatprep.subr.bf16.mxu0 %v2513_v57  ;;  %v2564_v57 = vld [vmem:[#allocation11 + $0x30] ss:$8 sps:$4 sm:$0xff]  }
 0x12f   : > { %901 = vmatpush1.bf16.msra.mxu0 %v2511_v58  ;;  %v2569_v58 = vld [vmem:[#allocation11 + $0x44] ss:$8 sps:$4 sm:$0xff]  }
 0x130   : > { %902 = vmatprep.subr.bf16.mxu0 %v2516_v59  ;;  %v2567_v59 = vld [vmem:[#allocation11 + $0x40] ss:$8 sps:$4 sm:$0xff]  }
 0x133   : > { %903 = vmatpush1.bf16.msra.mxu0 %v2514_v60  ;;  %v2572_v60 = vld [vmem:[#allocation11 + $0x54] ss:$8 sps:$4 sm:$0xff]  }
 0x134   : > { %904 = vmatprep.subr.bf16.mxu0 %v2519_v61  ;;  %v2570_v61 = vld [vmem:[#allocation11 + $0x50] ss:$8 sps:$4 sm:$0xff]  }
 0x137   : > { %905 = vmatpush1.bf16.msra.mxu0 %v2517_v62  ;;  %v2575_v62 = vld [vmem:[#allocation11 + $0x64] ss:$8 sps:$4 sm:$0xff]  }
 0x138   : > { %906 = vmatprep.subr.bf16.mxu0 %v2522_v63  ;;  %v2573_v63 = vld [vmem:[#allocation11 + $0x60] ss:$8 sps:$4 sm:$0xff]  }
 0x13b   : > { %907 = vmatpush1.bf16.msra.mxu0 %v2520_v0  ;;  %v2138_v0 = vld [vmem:[%s3443_s23] ss:$0 sm:$0xff] }
 0x13c   : > { %1448 = vmatprep.subr.bf16.mxu0 %v2557_v51  ;;  %v2611_v51 = vld [vmem:[#allocation13 + $0xe0] ss:$12 sps:$4 sm:$0xff]  }
 0x13e   : > { %925 = vmatmul.mubr.bf16.vlgmr.msra.gmra.mrb[0].mxu0 %v598_v2 }
 0x13f   : > { %1480 = vmatprep.mubr.bf16.mxu0 %v2934_v53  ;;  %1449 = vmatpush1.bf16.msra.mxu0 %v2555_v50  ;;  %v2558_v53 = vld [vmem:[#allocation11 + $0x10] ss:$8 sps:$4 sm:$0xff]  }
 0x140   : > { %1450 = vmatprep.subr.bf16.mxu0 %v2560_v52  ;;  %v2612_v52 = vld [vmem:[#allocation13 + $0x20] ss:$12 sps:$4 sm:$0xff]  }
 0x143   : > { %1451 = vmatpush1.bf16.msra.mxu0 %v2558_v53  ;;  %v2616_v53 = vld [vmem:[#allocation13 + $0xf8] ss:$12 sps:$4 sm:$0xff]  }
 0x144   : > { %1452 = vmatprep.subr.bf16.mxu0 %v2563_v54  ;;  %v2617_v54 = vld [vmem:[#allocation13 + $0x38] ss:$12 sps:$4 sm:$0xff]  }
 0x147   : > { %1453 = vmatpush1.bf16.msra.mxu0 %v2561_v55  ;;  %v2621_v55 = vld [vmem:[#allocation13 + $0x110] ss:$12 sps:$4 sm:$0xff]  }
 0x148   : > { %1454 = vmatprep.subr.bf16.mxu0 %v2566_v56  ;;  %v2622_v56 = vld [vmem:[#allocation13 + $0x50] ss:$12 sps:$4 sm:$0xff]  }
 0x14b   : > { %1455 = vmatpush1.bf16.msra.mxu0 %v2564_v57  ;;  %v2626_v57 = vld [vmem:[#allocation13 + $0x128] ss:$12 sps:$4 sm:$0xff]  }
 0x14c   : > { %1456 = vmatprep.subr.bf16.mxu0 %v2569_v58  ;;  %v2627_v58 = vld [vmem:[#allocation13 + $0x68] ss:$12 sps:$4 sm:$0xff]  }
 0x14f   : > { %1457 = vmatpush1.bf16.msra.mxu0 %v2567_v59  ;;  %v2631_v59 = vld [vmem:[#allocation13 + $0x140] ss:$12 sps:$4 sm:$0xff]  }
 0x150   : > { %1458 = vmatprep.subr.bf16.mxu0 %v2572_v60  ;;  %v2632_v60 = vld [vmem:[#allocation13 + $0x80] ss:$12 sps:$4 sm:$0xff]  }
 0x153   : > { %1459 = vmatpush1.bf16.msra.mxu0 %v2570_v61  ;;  %v2635_v61 = vld [vmem:[#allocation13 + $0x154] ss:$12 sps:$4 sm:$0xff]  }
 0x154   : > { %1460 = vmatprep.subr.bf16.mxu0 %v2575_v62  ;;  %v2636_v62 = vld [vmem:[#allocation13 + $0x158] ss:$12 sps:$4 sm:$0xff]  }
 0x157   : > { %1461 = vmatpush1.bf16.msra.mxu0 %v2573_v63  ;;  %v2633_v63 = vld [vmem:[#allocation13 + $0x150] ss:$12 sps:$4 sm:$0xff]  }
 0x158   : > { %1462 = vmatprep.subr.bf16.mxu0 %v2578_v8 }
 0x15b   : > { %1463 = vmatpush1.bf16.msra.mxu0 %v2576_v11 }
 0x211   : > { %v926_v15 = vpop.f32.mrb[0].mxu0 }
 0x212   : > { %v2325_v16 = vadd.f32 %v926_v15, %v604_v13  ;;  %v928_v17 = vpop.f32.mrb[1].mxu0  ;;  %v2579_v13 = vld [vmem:[#allocation13] ss:$12 sps:$4 sm:$0xff]   ;;  %v2584_v15 = vld [vmem:[#allocation13 + $0x1c] ss:$12 sps:$4 sm:$0xff]  }
 0x213   : > { %v2326_v18 = vadd.f32 %v928_v17, %v608_v14  ;;  %v930_v19 = vpop.f32.mrb[2].mxu0  ;;  %v2581_v14 = vld [vmem:[#allocation13 + $0x4] ss:$12 sps:$4 sm:$0xff]   ;;  %v2587_v17 = vld [vmem:[#allocation13 + $0x34] ss:$12 sps:$4 sm:$0xff]  }
 0x214   : > { %v933_v20 = vmax.f32 %v2325_v16, 0.0  ;;  %v931_v21 = vpop.f32.mrb[3].mxu0  ;;  %v2582_v16 = vld [vmem:[#allocation13 + $0x18] ss:$12 sps:$4 sm:$0xff]   ;;  %v2585_v19 = vld [vmem:[#allocation13 + $0x30] ss:$12 sps:$4 sm:$0xff]  }
 0x215   : > { %v934_v22 = vmax.f32 %v2326_v18, 0.0  ;;  %v2606_v18 = vld [vmem:[#allocation13 + $0xc8] ss:$12 sps:$4 sm:$0xff]  }
 0x216   : > { %v935_v25 = vpack.c.bf16 %v933_v20, %v933_v20  ;;  %v2590_v20 = vld [vmem:[#allocation13 + $0x4c] ss:$12 sps:$4 sm:$0xff]   ;;  %2263 = vmatprep.subr.bf16.mxu0 %v2606_v18  ;;  %v2588_v21 = vld [vmem:[#allocation13 + $0x48] ss:$12 sps:$4 sm:$0xff]  }
 0x217   : > { %v936_v23 = vpack.c.bf16 %v934_v22, %v934_v22  ;;  %v2593_v22 = vld [vmem:[#allocation13 + $0x64] ss:$12 sps:$4 sm:$0xff]  }
 0x219   : > { %1104 = vmatprep.mubr.bf16.mxu1 %v936_v23  ;;  %v2591_v23 = vld [vmem:[#allocation13 + $0x60] ss:$12 sps:$4 sm:$0xff]  }
 0x21a   : > { %1105 = vmatmul.mubr.bf16.vlgmr.msra.gmra.mrb[0].mxu1 %v935_v25  ;;  %v2594_v25 = vld [vmem:[#allocation13 + $0x78] ss:$12 sps:$4 sm:$0xff]  }
 0x21b   : > { %2286 = vmatpush3.bf16.msra.mxu1 %v2539_v24  ;;  %2301 = vmatprep.mubr.msk.bf16.mxu1 %vm2936_vm0, %v2935_v7  ;;  %v2596_v24 = vld [vmem:[#allocation13 + $0x7c] ss:$12 sps:$4 sm:$0xff]  }
 0x21c   : > { %2287 = vmatprep.subr.bf16.mxu1 %v2935_v7 }
 0x21f   : > { %2288 = vmatpush3.bf16.msra.mxu1 %v2540_v26  ;;  %v2599_v26 = vld [vmem:[#allocation13 + $0x94] ss:$12 sps:$4 sm:$0xff]  }
 0x220   : > { %2289 = vmatprep.subr.bf16.mxu1 %v2935_v7 }
 0x223   : > { %2290 = vmatpush3.bf16.msra.mxu1 %v2541_v27  ;;  %v2597_v27 = vld [vmem:[#allocation13 + $0x90] ss:$12 sps:$4 sm:$0xff]  }
 0x224   : > { %2291 = vmatprep.subr.bf16.mxu1 %v2935_v7 }
 0x227   : > { %2292 = vmatpush3.bf16.msra.mxu1 %v2542_v28  ;;  %v2602_v28 = vld [vmem:[#allocation13 + $0xac] ss:$12 sps:$4 sm:$0xff]  }
 0x228   : > { %2293 = vmatprep.subr.bf16.mxu1 %v2935_v7 }
 0x22b   : > { %2294 = vmatpush3.bf16.msra.mxu1 %v2543_v29  ;;  %v2600_v29 = vld [vmem:[#allocation13 + $0xa8] ss:$12 sps:$4 sm:$0xff]  }
 0x22c   : > { %2295 = vmatprep.subr.bf16.mxu1 %v2935_v7 }
 0x22f   : > { %2296 = vmatpush3.bf16.msra.mxu1 %v2544_v30  ;;  %v2605_v30 = vld [vmem:[#allocation13 + $0xc4] ss:$12 sps:$4 sm:$0xff]  }
 0x230   : > { %2297 = vmatprep.subr.bf16.mxu1 %v2935_v7 }
 0x233   : > { %2298 = vmatpush3.bf16.msra.mxu1 %v2545_v31  ;;  %v2603_v31 = vld [vmem:[#allocation13 + $0xc0] ss:$12 sps:$4 sm:$0xff]  }
 0x234   : > { %2299 = vmatprep.subr.bf16.mxu1 %v2935_v7 }
 0x237   : > { %2300 = vmatpush3.bf16.msra.mxu1 %v2546_v32  ;;  %v2610_v32 = vld [vmem:[#allocation13 + $0xdc] ss:$12 sps:$4 sm:$0xff]  }
 0x238   : > { %2305 = vmatprep.subr.bf16.mxu1 %v2935_v7 }
 0x2ed   : > { %v2239_v33 = vpop.f32.mrb[0].mxu1 }
 0x2ee   : > { %v2240_v35 = vpop.f32.mrb[1].mxu1 }
 0x2ef   : > { %v2241_v36 = vadd.f32 %v2240_v35, %v2239_v33  ;;  %v2242_v37 = vpop.f32.mrb[2].mxu1  ;;  %v2608_v33 = vld [vmem:[#allocation13 + $0xd8] ss:$12 sps:$4 sm:$0xff]   ;;  %v2613_v35 = vld [vmem:[#allocation13 + $0xf0] ss:$12 sps:$4 sm:$0xff]  }
 0x2f0   : > { %v2243_v38 = vpop.f32.mrb[3].mxu1  ;;  %v2618_v37 = vld [vmem:[#allocation13 + $0x108] ss:$12 sps:$4 sm:$0xff]  }
 0x2f1   : > { %v1107_v39 = vadd.f32 %v2241_v36, %v2121_v34  ;;  %v2615_v34 = vld [vmem:[#allocation13 + $0xf4] ss:$12 sps:$4 sm:$0xff]   ;;  %v2620_v36 = vld [vmem:[#allocation13 + $0x10c] ss:$12 sps:$4 sm:$0xff]   ;;  %v2625_v38 = vld [vmem:[#allocation13 + $0x124] ss:$12 sps:$4 sm:$0xff]  }
 0x2f3   : > { %v1112_v40 = vmax.f32 %v1107_v39, 0.0  ;;  %v2623_v39 = vld [vmem:[#allocation13 + $0x120] ss:$12 sps:$4 sm:$0xff]  }
 0x2f5   : > { %v1113_v42 = vpack.c.bf16 %v1112_v40, %v1112_v40  ;;  %v2630_v40 = vld [vmem:[#allocation13 + $0x13c] ss:$12 sps:$4 sm:$0xff]  }
 0x2f7   : > { %2302 = vmatmul.mubr.bf16.vlgmr.msra.gmra.mrb[4].mxu1 %v1113_v42  ;;  %v2147_v42 = vld [vmem:[%s3444_s10] ss:$0 sm:$0xff]  ;;  %s2841_s10 = scalar_lea.vmem %s3351_s29, 384 }
 0x2f8   : > { %2306 = vmatpush3.bf16.msra.mxu1 %v2547_v41  ;;  %2321 = vmatprep.mubr.msk.bf16.mxu1 %vm2936_vm0, %v2935_v7  ;;  %v2628_v41 = vld [vmem:[#allocation13 + $0x138] ss:$12 sps:$4 sm:$0xff]   ;;  %p2842_p0 = scmp.ne.s32.totalorder %s3351_s29, %s2841_s10 }
 0x2f9   : > { %2307 = vmatprep.subr.bf16.mxu1 %v2935_v7 }
 0x2fa   : > { %p2843_p10 = pnand %p2842_p0, %p3448_p5 }
 0x2fc   : > { %2308 = vmatpush3.bf16.msra.mxu1 %v2548_v43  ;;  %p2844_p1 = pneg %p2843_p10 }
 0x2fd   : > { %2309 = vmatprep.subr.bf16.mxu1 %v2935_v7 }
 0x300   : > { %2310 = vmatpush3.bf16.msra.mxu1 %v2549_v44 }
 0x301   : > { %2311 = vmatprep.subr.bf16.mxu1 %v2935_v7 }
 0x304   : > { %2312 = vmatpush3.bf16.msra.mxu1 %v2550_v45 }
 0x305   : > { %2313 = vmatprep.subr.bf16.mxu1 %v2935_v7 }
 0x308   : > { %2314 = vmatpush3.bf16.msra.mxu1 %v2551_v46 }
 0x309   : > { %2315 = vmatprep.subr.bf16.mxu1 %v2935_v7 }
 0x30c   : > { %2316 = vmatpush3.bf16.msra.mxu1 %v2552_v47 }
 0x30d   : > { %2317 = vmatprep.subr.bf16.mxu1 %v2935_v7 }
 0x310   : > { %2318 = vmatpush3.bf16.msra.mxu1 %v2553_v48 }
 0x311   : > { %2319 = vmatprep.subr.bf16.mxu1 %v2935_v7 }
 0x314   : > { %2320 = vmatpush3.bf16.msra.mxu1 %v2554_v49  ;;  %v2607_v49 = vld [vmem:[#allocation13 + $0x8] ss:$12 sps:$4 sm:$0xff]  }
 0x315   : > { %1830 = vmatprep.subr.bf16.mxu1 %v2581_v14 }
 0x3ca   : > { %v1219_v1 = vpop.f32.mrb[4].mxu1 }
 0x3cb   : > { %v1220_v2 = vadd.f32 %v2138_v0, %v1219_v1  ;;  %v2303_v3 = vpop.f32.mrb[5].mxu1  ;;  %v2637_v0 = vld [vmem:[#allocation13 + $0x98] ss:$12 sps:$4 sm:$0xff]  }
 0x3cc   : > { %v1222_v4 = vpop.f32.mrb[6].mxu1  ;;  %v2640_v1 = vld [vmem:[#allocation13 + $0x16c] ss:$12 sps:$4 sm:$0xff]   ;;  %v2638_v3 = vld [vmem:[#allocation13 + $0x168] ss:$12 sps:$4 sm:$0xff]  }
 0x3cd   : > { %v1225_v5 = vmax.f32 %v1220_v2, 0.0  ;;  %v2304_v6 = vpop.f32.mrb[7].mxu1  ;;  %v2641_v2 = vld [vmem:[#allocation13 + $0x170] ss:$12 sps:$4 sm:$0xff]  }
 0x3ce   : > { %v2642_v4 = vld [vmem:[#allocation13 + $0xb0] ss:$12 sps:$4 sm:$0xff]  }
 0x3cf   : > { %v1226_v7 = vpack.c.bf16 %v1225_v5, %v1225_v5  ;;  %v1356_v5 = vld [vmem:[%s3445_s19] sm:$0x3]  ;;  %s2847_s19 = scalar_lea.vmem %s2846_s30, 768 }
 0x3d0   : > { %v1361_v6 = vrot.slane %v1356_v5, %v3296_v10  ;;  %p2849_p12 = scmp.lt.s32.totalorder %s2847_s19, %s2841_s10 }
 0x3d1   : > { %2322 = vmatmul.mubr.bf16.vlgmr.msra.gmra.mrb[8].mxu1 %v1226_v7  ;;  %v1365_v7 = vrot.slane %v1356_v5, %v3302_v12 }
 0x3d2   : > { %1831 = vmatpush1.bf16.msra.mxu1 %v2579_v13  ;;  %p2850_p13 = por %p2849_p12, %p2848_p11 }
 0x3d3   : > { %1832 = vmatprep.subr.bf16.mxu1 %v2584_v15 }
 0x3d4   : > { %p2851_p3 = pnand %p2850_p13, %p2844_p1 }
 0x3d6   : > { %1833 = vmatpush1.bf16.msra.mxu1 %v2582_v16 }
 0x3d7   : > { %1834 = vmatprep.subr.bf16.mxu1 %v2587_v17 }
 0x3da   : > { %1835 = vmatpush1.bf16.msra.mxu1 %v2585_v19 }
 0x3db   : > { %1836 = vmatprep.subr.bf16.mxu1 %v2590_v20 }
 0x3de   : > { %1837 = vmatpush1.bf16.msra.mxu1 %v2588_v21  ;;  %v1557_v21 = vld [vmem:[%s3446_s8] sm:$0x7] }
 0x3df   : > { %1838 = vmatprep.subr.bf16.mxu1 %v2593_v22  ;;  %v1569_v22 = vsub.s32 2, %v3293_v9 }
 0x3e2   : > { %1839 = vmatpush1.bf16.msra.mxu1 %v2591_v23  ;;  %v1562_v23 = vrot.slane %v1557_v21, %v3296_v10 }
 0x3e3   : > { %1840 = vmatprep.subr.bf16.mxu1 %v2596_v24  ;;  %v1566_v24 = vrot.slane %v1557_v21, %v3302_v12 }
 0x3e6   : > { %1841 = vmatpush1.bf16.msra.mxu1 %v2594_v25 }
 0x3e7   : > { %1842 = vmatprep.subr.bf16.mxu1 %v2599_v26 }
 0x3ea   : > { %1843 = vmatpush1.bf16.msra.mxu1 %v2597_v27  ;;  %v1570_v27 = vrot.slane %v1557_v21, %v1569_v22 }
 0x3eb   : > { %1844 = vmatprep.subr.bf16.mxu1 %v2602_v28 }
 0x3ee   : > { %1845 = vmatpush1.bf16.msra.mxu1 %v2600_v29 }
 0x3ef   : > { %1846 = vmatprep.subr.bf16.mxu1 %v2605_v30 }
 0x3f2   : > { %1847 = vmatpush1.bf16.msra.mxu1 %v2603_v31 }
 0x3f3   : > { %1848 = vmatprep.subr.bf16.mxu1 %v2610_v32 }
 0x3f6   : > { %1849 = vmatpush1.bf16.msra.mxu1 %v2608_v33 }
 0x3f7   : > { %1850 = vmatprep.subr.bf16.mxu1 %v2615_v34 }
 0x3fa   : > { %1851 = vmatpush1.bf16.msra.mxu1 %v2613_v35 }
 0x3fb   : > { %1852 = vmatprep.subr.bf16.mxu1 %v2620_v36 }
 0x3fe   : > { %1853 = vmatpush1.bf16.msra.mxu1 %v2618_v37 }
 0x3ff   : > { %1854 = vmatprep.subr.bf16.mxu1 %v2625_v38 }
 0x402   : > { %1855 = vmatpush1.bf16.msra.mxu1 %v2623_v39 }
 0x403   : > { %1856 = vmatprep.subr.bf16.mxu1 %v2630_v40 }
 0x406   : > { %1857 = vmatpush1.bf16.msra.mxu1 %v2628_v41 }
 0x407   : > { %1858 = vmatprep.subr.bf16.mxu1 %v2635_v61 }
 0x40a   : > { %1859 = vmatpush1.bf16.msra.mxu1 %v2633_v63 }
 0x40b   : > { %1860 = vmatprep.subr.bf16.mxu1 %v2640_v1 }
 0x40e   : > { %1861 = vmatpush1.bf16.msra.mxu1 %v2638_v3 }
 0x4a4   : > { %v1332_v43 = vpop.f32.mrb[8].mxu1 }
 0x4a5   : > { %v1333_v44 = vadd.f32 %v2147_v42, %v1332_v43  ;;  %v2323_v45 = vpop.f32.mrb[9].mxu1 }
 0x4a6   : > { %v1335_v46 = vpop.f32.mrb[10].mxu1 }
 0x4a7   : > { %v1338_v47 = vmax.f32 %v1333_v44, 0.0  ;;  %v2324_v48 = vpop.f32.mrb[11].mxu1 }
 0x4a9   : > { %v1339_v50 = vpack.c.bf16 %v1338_v47, %v1338_v47 }
 0x4ab   : > { %1481 = vmatmul.mubr.bf16.vlgmr.msra.gmra.mrb[4].mxu0 %v1339_v50 }
 0x4ac   : > { %2264 = vmatpush3.bf16.msra.mxu0 %v2607_v49 }
 0x4ad   : > { %2265 = vmatprep.subr.bf16.mxu0 %v2611_v51 }
 0x4b0   : > { %2266 = vmatpush3.bf16.msra.mxu0 %v2612_v52 }
 0x4b1   : > { %2267 = vmatprep.subr.bf16.mxu0 %v2616_v53 }
 0x4b4   : > { %2268 = vmatpush3.bf16.msra.mxu0 %v2617_v54 }
 0x4b5   : > { %2269 = vmatprep.subr.bf16.mxu0 %v2621_v55 }
 0x4b8   : > { %2270 = vmatpush3.bf16.msra.mxu0 %v2622_v56 }
 0x4b9   : > { %2271 = vmatprep.subr.bf16.mxu0 %v2626_v57 }
 0x4bc   : > { %2272 = vmatpush3.bf16.msra.mxu0 %v2627_v58 }
 0x4bd   : > { %2273 = vmatprep.subr.bf16.mxu0 %v2631_v59 }
 0x4c0   : > { %2274 = vmatpush3.bf16.msra.mxu0 %v2632_v60 }
 0x4c1   : > { %2275 = vmatprep.subr.bf16.mxu0 %v2636_v62 }
 0x4c4   : > { %2276 = vmatpush3.bf16.msra.mxu0 %v2637_v0 }
 0x4c5   : > { %2277 = vmatprep.subr.bf16.mxu0 %v2641_v2 }
 0x4c8   : > { %2278 = vmatpush3.bf16.msra.mxu0 %v2642_v4 }
 0x57e   : > { %v1482_v8 = vpop.f32.mrb[4].mxu0 }
 0x57f   : > { %v1483_v11 = vadd.f32 %v1482_v8, %v1361_v6  ;;  %v1484_v13 = vpop.f32.mrb[5].mxu0 }
 0x580   : > { %v1485_v14 = vadd.f32 %v1484_v13, %v1365_v7  ;;  %v1486_v15 = vpop.f32.mrb[6].mxu0 }
 0x581   : > { %v1489_v16 = vmax.f32 %v1483_v11, 0.0  ;;  %v1487_v17 = vpop.f32.mrb[7].mxu0 }
 0x582   : > { %v1490_v18 = vmax.f32 %v1485_v14, 0.0 }
 0x583   : > { %v1491_v20 = vpack.c.bf16 %v1489_v16, %v1489_v16 }
 0x584   : > { %v1492_v19 = vpack.c.bf16 %v1490_v18, %v1490_v18 }
 0x586   : > { %1862 = vmatprep.mubr.bf16.mxu1 %v1492_v19  ;;  %1903 = vmatprep.mubr.bf16.mxu0 %v1492_v19 }
 0x587   : > { %1863 = vmatmul.mubr.bf16.vlgmr.msra.gmra.mrb[12].mxu1 %v1491_v20  ;;  %1904 = vmatmul.mubr.bf16.vlgmr.msra.gmra.mrb[8].mxu0 %v1491_v20 }
 0x65a   : > { %v1864_v25 = vpop.f32.mrb[12].mxu1  ;;  %v2279_v26 = vpop.f32.mrb[8].mxu0 }
 0x65b   : > { %v1865_v28 = vadd.f32 %v1864_v25, %v1562_v23  ;;  %v1866_v29 = vpop.f32.mrb[13].mxu1  ;;  %v2280_v30 = vpop.f32.mrb[9].mxu0 }
 0x65c   : > { %v1867_v31 = vadd.f32 %v1866_v29, %v1566_v24  ;;  %v2281_v32 = vadd.f32 %v2280_v30, %v2279_v26  ;;  %v1868_v33 = vpop.f32.mrb[14].mxu1  ;;  %v2282_v9 = vpop.f32.mrb[10].mxu0 }
 0x65d   : > { %1911 = vst [vmem:[%s543_s22] sm:$0xff] %v1865_v28  ;;  %v1869_v10 = vpop.f32.mrb[15].mxu1  ;;  %v2283_v34 = vpop.f32.mrb[11].mxu0 }
 0x65e   : > { %1912 = vst [vmem:[%s543_s22 + $0x8] sm:$0xff] %v1867_v31  ;;  %v1906_v12 = vadd.f32 %v2281_v32, %v1570_v27 }
 0x660   : > { %1913 = vst [vmem:[%s543_s22 + $0x10] sm:$0xff] %v1906_v12 }
 0x661   : > { %2854 = shalt.err (!%p2851_p3)
}
 0x662   : > { %s2855_s1 = scalar_lea.hbm %s3349_s21, 384  ;;  %s2859_s8 = scalar_lea.hbm %s3447_s14, 768 }
 0x663   : > { %p2856_p7 = scmp.ne.s32.totalorder %s3349_s21, %s2855_s1  ;;  %p2860_p8 = scmp.lt.u32.totalorder %s3349_s21, %s3447_s14 }
 0x664   : > { %p2861_p6 = scmp.lt.u32.totalorder %s2859_s8, %s2855_s1  ;;  %p2863_p0 = scmp.lt.u32.totalorder %s2855_s1, %s3349_s21 }
 0x665   : > { %p2857_p9 = pnand %p2856_p7, %p3448_p5 }
 0x666   : > { %p2862_p2 = por %p2861_p6, %p2860_p8 }
 0x667   : > { %p2858_p4 = pneg %p2857_p9 }
 0x668   : > { %p2864_p10 = por %p2863_p0, %p2862_p2 }
 0x66a   : > { %p2865_p1 = pnand %p2864_p10, %p2858_p4 }
 0x66c   : > { %2868 = shalt.err (!%p2865_p1)
}
 0x66d   : > { %2361 = dma.vmem_to_hbm [thread:$0]  (%p3448_p5), %s3351_s29, 384, %s3349_s21, %s1915_s18  }
 0x66e PF: > { %s1941_s23 = sand.u32 1, %s2907_s25   ;;  %p3449_p11 = scmp.ne.s32.totalorder %s3434_s17, 0 }
 0x66f   : > { %p3450_p12 = scmp.ge.s32.totalorder %s2919_s28, 2  ;;  %s1942_s6 = scalar_lea.sflag [#allocation4], %s1941_s23 }
 0x671   : > { %p2387_p13 = pnand %p3450_p12, %p3449_p11 }
 0x673   : > { %2902 = dma.done.wait (!%p2387_p13), %s1942_s6, 384  }
 0x674   : > { %2904 = vsyncadd (!%p2387_p13), %s1942_s6, 4294966912  ;;  %p29_p3 = scmp.ge.s32.totalorder %s3195_s20, 4   ;;  %s3451_s25 = smov %s2911_s26 }
 0x675   : > { %s3452_s26 = smov %s2915_s27  ;;  %s3453_s27 = smov %s3206_s12 }
 0x676   : > { %s3454_s28 = smov %s3195_s20  ;;  %31 = sbr.rel (!%p29_p3) target bundleno = 16 (0x10), region = 141 }
 0x67d   :  { %1947 = vsyncpa [#allocation3], 1 }
 0x67e   :  { %1949 = vsyncpa [#allocation3 + $0x1], 1 }
 0x67f   :  { %1950 = vsyncpa [#allocation6], 1 }
 0x680   :  { %1951 = vsyncpa [#allocation9], 1 }
 0x681   :  { %1952 = vsyncpa [#allocation12], 1 }
 0x682   :  { %1953 = vsyncpa [#allocation4], 1 }
 0x683   :  { %1955 = vsyncpa [#allocation4 + $0x1], 1 }

</bundles_post_ra>
